<compile_context>
chip_gen: v6e
topology: v6e:2x2x1
jax: 0.10.0
libtpu: 0.0.40
codegen_flags: <defaults>
</compile_context>

<pallas_src>
import jax
import jax.numpy as jnp
from jax.experimental import pallas as pl
from jax.experimental.pallas import tpu as pltpu


def _logreg_kernel(x_ref, w_ref, b_ref, o_ref):
    # x_ref: (TB, D) native dtype | w_ref: (1, D) same dtype | b_ref: (1, 1) f32 in SMEM
    # o_ref: (1, TB) f32  (lane-dense)
    logits = jax.lax.dot_general(
        w_ref[...], x_ref[...],
        dimension_numbers=(((1,), (1,)), ((), ())),   # contract D with D -> (1, TB)
        preferred_element_type=jnp.float32,
        precision=jax.lax.Precision.HIGHEST,
    )
    o_ref[...] = jax.nn.sigmoid(logits + b_ref[0, 0])


def _round_up(n, m):
    return ((n + m - 1) // m) * m


def logistic_regression_forward(x, weight, bias):
    """x: (B, D) f32/bf16; weight: (1, D) (PyTorch nn.Linear layout); bias: (1,)."""
    B, D = x.shape
    itemsize = jnp.dtype(x.dtype).itemsize
    row_bytes = D * itemsize
    # Sublane pack factor: 8 rows (f32), 16 (bf16), 32 (int8/fp8).
    pack = 8 * max(1, 4 // itemsize)

    # --- Generation-aware tile sizing: biggest double-buffered x tile that fits VMEM ----
    try:
        info = pltpu.get_tpu_info()
        vmem_cap = int(getattr(info, "vmem_capacity_bytes", 64 * 1024 * 1024))
    except Exception:
        vmem_cap = 64 * 1024 * 1024  # conservative fallback (v7x per-TC)
    per_buffer_bytes = max(4 << 20, min(16 << 20, vmem_cap // 6))

    tb = per_buffer_bytes // max(1, row_bytes)
    tb = max(pack, (tb // 128) * 128)            # unmasked lane-dense stores + pack alignment
    # Huge-D guard: never let the double-buffered x tile exceed half of physical VMEM.
    while tb > pack and 2 * tb * row_bytes > vmem_cap // 2:
        tb = max(pack, (tb // 2 // pack) * pack)
    # Don't allocate a tile bigger than the (pack-aligned) batch.
    tb = min(tb, _round_up(B, pack))

    num_tiles = pl.cdiv(B, tb)                   # ragged last block handled by Pallas

    w2 = weight.reshape(1, D).astype(x.dtype)    # lane-dense, streams natively into the MXU
    b2 = bias.reshape(1, 1).astype(jnp.float32)

    # VMEM budget: 2x pipelined x tiles + 2x (1, tb) f32 out tiles + resident weight + slack.
    need = 2 * tb * row_bytes + 2 * tb * 4 + _round_up(row_bytes, 1024)
    vmem_limit = int(min(vmem_cap * 3 // 4, need + (16 << 20)))

    cost = pl.CostEstimate(
        flops=2 * B * D,
        transcendentals=B,
        bytes_accessed=B * row_bytes + row_bytes + num_tiles * tb * 4,
    )

    out = pl.pallas_call(
        _logreg_kernel,
        out_shape=jax.ShapeDtypeStruct((num_tiles, tb), jnp.float32),
        grid_spec=pltpu.PrefetchScalarGridSpec(
            num_scalar_prefetch=0,
            grid=(num_tiles,),
            in_specs=[
                pl.BlockSpec((tb, D), lambda i: (i, 0)),            # x tile (pipelined)
                pl.BlockSpec((1, D), lambda i: (0, 0)),             # weight (resident)
                pl.BlockSpec(memory_space=pltpu.MemorySpace.SMEM),  # bias scalar
            ],
            out_specs=pl.BlockSpec((1, tb), lambda i: (i, 0)),      # lane-dense output
        ),
        compiler_params=pltpu.CompilerParams(
            dimension_semantics=("parallel",),
            vmem_limit_bytes=vmem_limit,
        ),
        cost_estimate=cost,
    )(x, w2, b2)

    # (num_tiles, tb) -> (B, 1); drops the ragged-tail garbage columns.
    return out.reshape(num_tiles * tb)[:B].reshape(B, 1)


def _reference(x, weight, bias):
    logits = jnp.dot(x.astype(jnp.float32), weight.astype(jnp.float32).T,
                     precision=jax.lax.Precision.HIGHEST) + bias
    return jax.nn.sigmoid(logits)


if __name__ == "__main__":
    key = jax.random.PRNGKey(0)
    kx, kw, kb = jax.random.split(key, 3)

    batch = 8
    input_dim = 32  # corresponds to X_train.shape[1]

    x = jax.random.normal(kx, (batch, input_dim), dtype=jnp.float32)
    # Deterministic parameter init (mimics nn.Linear uniform(-1/sqrt(D), 1/sqrt(D)))
    bound = 1.0 / float(input_dim) ** 0.5
    weight = jax.random.uniform(kw, (1, input_dim), jnp.float32, -bound, bound)
    bias = jax.random.uniform(kb, (1,), jnp.float32, -bound, bound)

    out = logistic_regression_forward(x, weight, bias)
    out = jax.block_until_ready(out)

    ref = _reference(x, weight, bias)
    assert out.shape == (batch, 1), out.shape
    assert jnp.allclose(out, ref, atol=1e-5, rtol=1e-5), "mismatch vs reference"
    print("KERNEL_OK")
</pallas_src>

<mosaic_0001>
module attributes {stable_mosaic.version = 11 : i64} {
  func.func @_logreg_kernel(%arg0: i32, %arg1: memref<8x32xf32, #tpu.memory_space<vmem>>, %arg2: memref<1x32xf32, #tpu.memory_space<vmem>>, %arg3: memref<1x1xf32, #tpu.memory_space<smem>>, %arg4: memref<1x8xf32, #tpu.memory_space<vmem>>) attributes {dimension_semantics = [#tpu.dimension_semantics<parallel>], iteration_bounds = array<i64: 1>, scalar_prefetch = 0 : i64, scratch_operands = 0 : i64, tpu.core_type = #tpu.core_type<tc>, window_params = [{transform_indices = @transform_0, window_bounds = array<i64: 8, 32>}, {pipeline_mode = #tpu.pipeline_mode<synchronous>, transform_indices = @transform_1, window_bounds = array<i64: 1, 32>}, {transform_indices = @transform_2, window_bounds = array<i64: 1, 1>}, {transform_indices = @transform_3, window_bounds = array<i64: 1, 8>}]} {
    %c0 = arith.constant 0 : index
    %c0_0 = arith.constant 0 : index
    %0 = vector.load %arg2[%c0, %c0_0] : memref<1x32xf32, #tpu.memory_space<vmem>>, vector<1x32xf32>
    %c0_1 = arith.constant 0 : index
    %c0_2 = arith.constant 0 : index
    %1 = vector.load %arg1[%c0_1, %c0_2] : memref<8x32xf32, #tpu.memory_space<vmem>>, vector<8x32xf32>
    %cst = arith.constant dense<0.000000e+00> : vector<1x8xf32>
    %2 = tpu.matmul %0, %1, %cst {dimension_numbers = #tpu.dot_dimension_numbers<[1], [1], [0], [0], [0, 0, 1, 0], [], []>, precision = #tpu.contract_precision<fp32>} : vector<1x32xf32>, vector<8x32xf32>, vector<1x8xf32> -> vector<1x8xf32>
    %c0_3 = arith.constant 0 : index
    %c0_4 = arith.constant 0 : index
    %3 = memref.load %arg3[%c0_3, %c0_4] : memref<1x1xf32, #tpu.memory_space<smem>>
    %4 = vector.broadcast %3 : f32 to vector<1x8xf32>
    %5 = arith.addf %2, %4 : vector<1x8xf32>
    %6 = arith.negf %5 : vector<1x8xf32>
    %7 = math.exp %6 : vector<1x8xf32>
    %cst_5 = arith.constant 1.000000e+00 : f32
    %8 = vector.broadcast %cst_5 : f32 to vector<1x8xf32>
    %9 = arith.addf %8, %7 : vector<1x8xf32>
    %10 = arith.divf %8, %9 : vector<1x8xf32>
    %c0_6 = arith.constant 0 : index
    %c0_7 = arith.constant 0 : index
    %11 = vector.load %arg4[%c0_6, %c0_7] : memref<1x8xf32, #tpu.memory_space<vmem>>, vector<1x8xf32>
    tpu.vector_store %arg4[%c0_6, %c0_7], %10 {strides = array<i32>} : memref<1x8xf32, #tpu.memory_space<vmem>>, vector<1x8xf32>,
    return
  }
  func.func @transform_0(%arg0: i32) -> (i32, i32) {
    %c0_i32 = arith.constant 0 : i32
    %c0_i32_0 = arith.constant 0 : i32
    return %arg0, %c0_i32 : i32, i32
  }
  func.func @transform_1(%arg0: i32) -> (i32, i32) {
    %c0_i32 = arith.constant 0 : i32
    %c0_i32_0 = arith.constant 0 : i32
    %c0_i32_1 = arith.constant 0 : i32
    return %c0_i32, %c0_i32_0 : i32, i32
  }
  func.func @transform_2(%arg0: i32) -> (i32, i32) {
    %c0_i32 = arith.constant 0 : i32
    %c0_i32_0 = arith.constant 0 : i32
    %c0_i32_1 = arith.constant 0 : i32
    return %c0_i32, %c0_i32_0 : i32, i32
  }
  func.func @transform_3(%arg0: i32) -> (i32, i32) {
    %c0_i32 = arith.constant 0 : i32
    %c0_i32_0 = arith.constant 0 : i32
    return %arg0, %c0_i32 : i32, i32
  }
}

</mosaic_0001>

<bundles_post_ra>
// kernel: tpu_custom_call.1
= control target key start
LH: loop header
LB: loop body
LE: loop exit
PB: predicated region body
PF: predicated region fallthrough
CT: control target
= control target key end

     0   :  { %9 = vsyncpa [#allocation4], 0  ;;  %s645_s0 = inlined_call_operand.hbm [shape: f32[8,32], index: 0, kind: input, shape index: {}]   ;;  %s646_s1 = inlined_call_operand.vmem [shape: f32[1,32], index: 1, kind: input, shape index: {}]   ;;  %s647_s2 = inlined_call_operand.<no memory space> [shape: f32[1,1], index: 2, kind: input, shape index: {}]   ;;  %s648_s3 = inlined_call_operand.hbm [shape: f32[1,8], index: 3, kind: output, shape index: {}]  }
   0x1   :  { %10 = vsyncpa [#allocation5], 0  ;;  %s603_s12 = smov [#allocation3]  }
   0x2   :  { %s17_s13 = sshll.u32 %s603_s12, 4  ;;  %s18_s13 = int_to_ptr.vmem [resolvable:$true] %s17_s13 }
   0x3   :  { %s567_s14 = scalar_lea.vmem %s18_s13, 128  ;;  %p572_p1 = scmp.lt.s32.totalorder %s18_s13, %s18_s13 }
   0x4   :  { %p568_p0 = scmp.ne.s32.totalorder %s18_s13, %s567_s14  ;;  %p573_p2 = scmp.lt.s32.totalorder %s567_s14, %s567_s14 }
   0x6   :  { %p574_p3 = por %p573_p2, %p572_p1 }
   0x8   :  { %p575_p4 = pnand %p574_p3, %p568_p0 }
   0xa   :  { %578 = shalt.err (!%p575_p4)
}
   0xb   :  { %20 = dma.hbm_to_vmem [thread:$0]  %s645_s0, 128, %s18_s13, [#allocation4]  }
   0xc   :  { %599 = dma.done.wait [#allocation4], 128  }
   0xd   :  { %600 = vsyncadd [#allocation4], 4294967168  ;;  %v604_v0 = vmov 0.0   ;;  %vm605_vm0 = vmmov 0   ;;  %vm32_vm1 = vcmask 261120   ;;  %v29_v1 = vld [vmem:[#allocation3] sm:$0xff]  ;;  %v31_v15 = vstv %s647_s2 }
   0xe   :  { %521 = vmatprep.subr.mxu0 %v604_v0  ;;  %523 = vmatprep.mubr.msk.f32.mxu0 %vm605_vm0, %v604_v0  ;;  %v28_v2 = vld [vmem:[%s646_s1] sm:$0x1]  ;;  %v37_v3 = vsel %vm32_vm1, %v29_v1, 0  ;;  %s606_s2 = smov [#allocation6]   ;;  %vm491_vm2 = vcmask 57344  }
   0xf   :  { %526 = vmatprep.subr.mxu1 %v604_v0  ;;  %528 = vmatprep.mubr.msk.f32.mxu1 %vm605_vm0, %v604_v0  ;;  %v34_v4 = vsel %vm32_vm1, %v28_v2, 0  ;;  %v70_v5 = vand.u32 4294901760, %v37_v3  ;;  %s499_s19 = sshll.u32 %s606_s2, 4  ;;  %s500_s19 = int_to_ptr.vmem [resolvable:$true] %s499_s19 }
  0x10   :  { %v105_v6 = vand.u32 4294901760, %v34_v4  ;;  %s579_s20 = scalar_lea.vmem %s500_s19, 16  ;;  %s583_s21 = scalar_lea.vmem %s500_s19, 32 }
  0x11   :  { %522 = vmatpush3.xpose.msra.mxu0 %v70_v5  ;;  %v147_v8 = vsub.f32 %v37_v3, %v70_v5  ;;  %p580_p5 = scmp.ne.s32.totalorder %s500_s19, %s579_s20  ;;  %p584_p6 = scmp.lt.s32.totalorder %s500_s19, %s500_s19 }
  0x12   :  { %v106_v7 = vsub.f32 %v34_v4, %v105_v6  ;;  %531 = vmatprep.subr.mxu0 %v604_v0  ;;  %p585_p7 = scmp.lt.s32.totalorder %s583_s21, %s579_s20 }
  0x13   :  { %v148_v10 = vand.u32 4294901760, %v147_v8 }
  0x14   :  { %v107_v9 = vand.u32 4294901760, %v106_v7  ;;  %p586_p8 = por %p585_p7, %p584_p6 }
  0x15   :  { %v149_v12 = vsub.f32 %v147_v8, %v148_v10 }
  0x16   :  { %v108_v11 = vsub.f32 %v106_v7, %v107_v9  ;;  %p587_p9 = pnand %p586_p8, %p580_p5 }
  0x17   :  { %v150_v14 = vand.u32 4294901760, %v149_v12 }
  0x18   :  { %v109_v13 = vand.u32 4294901760, %v108_v11 }
  0x19   :  { %527 = vmatpush3.xpose.msra.mxu1 %v150_v14 }
  0x1a   :  { %524 = vmatmul.mubr.f32.vlgmr.msra.gmra.mxu0 %v109_v13  ;;  %536 = vmatprep.subr.mxu1 %v604_v0 }
  0x1b   :  { %532 = vmatpush3.xpose.msra.mxu0 %v147_v8  ;;  %533 = vmatprep.mubr.msk.f32.mxu0 %vm605_vm0, %v604_v0 }
  0x1c   :  { %541 = vmatprep.subr.mxu0 %v604_v0  ;;  %529 = vmatmul.mubr.f32.vlgmr.msra.gmra.mxu1 %v105_v6 }
  0x1d   :  { %537 = vmatpush3.xpose.msra.mxu1 %v70_v5  ;;  %538 = vmatprep.mubr.msk.f32.mxu1 %vm605_vm0, %v604_v0 }
  0x1e   :  { %534 = vmatmul.mubr.f32.vlgmr.msra.gmra.mxu0 %v106_v7  ;;  %546 = vmatprep.subr.mxu1 %v604_v0 }
  0x1f   :  { %542 = vmatpush3.xpose.msra.mxu0 %v148_v10  ;;  %543 = vmatprep.mubr.msk.f32.mxu0 %vm605_vm0, %v604_v0 }
  0x20   :  { %539 = vmatmul.mubr.f32.vlgmr.msra.gmra.mxu1 %v107_v9 }
  0x21   :  { %547 = vmatpush3.xpose.msra.mxu1 %v70_v5  ;;  %548 = vmatprep.mubr.msk.f32.mxu1 %vm605_vm0, %v604_v0 }
  0x22   :  { %544 = vmatmul.mubr.f32.vlgmr.msra.gmra.mxu0 %v105_v6 }
  0x24   :  { %549 = vmatmul.mubr.f32.vlgmr.msra.gmra.mxu1 %v105_v6 }
  0xda   :  { %v111_v16 = vpop.f32.mrf.mxu0 }
  0xdb   :  { %v112_v17 = vadd.f32 %v111_v16, %v31_v15 }
  0xdc   :  { %v525_v18 = vpop.f32.mrf.mxu0  ;;  %v187_v19 = vpop.f32.mrf.mxu1 }
  0xdd   :  { %v188_v20 = vadd.f32 %v187_v19, %v112_v17 }
  0xde   :  { %v261_v21 = vpop.f32.mrf.mxu0  ;;  %v530_v22 = vpop.f32.mrf.mxu1 }
  0xdf   :  { %v262_v23 = vadd.f32 %v261_v21, %v188_v20 }
  0xe0   :  { %v535_v24 = vpop.f32.mrf.mxu0  ;;  %v335_v25 = vpop.f32.mrf.mxu1 }
  0xe1   :  { %v336_v26 = vadd.f32 %v335_v25, %v262_v23 }
  0xe2   :  { %v409_v27 = vpop.f32.mrf.mxu0  ;;  %v540_v28 = vpop.f32.mrf.mxu1 }
  0xe3   :  { %v410_v29 = vadd.f32 %v409_v27, %v336_v26 }
  0xe4   :  { %v545_v30 = vpop.f32.mrf.mxu0  ;;  %v481_v31 = vpop.f32.mrf.mxu1 }
  0xe5   :  { %v482_v32 = vadd.f32 %v481_v31, %v410_v29 }
  0xe6   :  { %v550_v33 = vpop.f32.mrf.mxu1 }
  0xe7   :  { %v508_v34 = vmul.f32 -1.442695, %v482_v32 }
  0xe9   :  { %555 = vpow2.f32 %v508_v34 }
  0xf6   :  { %v556_v35 = vpop.eup %555 }
  0xf7   :  { %v488_v36 = vadd.f32 1.0, %v556_v35 }
  0xf9   :  { %557 = vrcp.f32 %v488_v36 }
 0x106   :  { %v558_v37 = vpop.eup %557 }
 0x107   :  { %492 = vst.msk [vmem:[#allocation6] sm:$0x1] %vm491_vm2, %v558_v37 }
 0x108   :  { %590 = shalt.err (!%p587_p9)
}
 0x109   :  { %502 = dma.vmem_to_hbm [thread:$0]  %s500_s19, 16, %s648_s3, [#allocation5]  }
 0x10a   :  { %601 = dma.done.wait [#allocation5], 16  }
 0x10b   :  { %602 = vsyncadd [#allocation5], 4294967280 }
 0x10c   :  { %506 = vsyncpa [#allocation4], 1 }
 0x10d   :  { %507 = vsyncpa [#allocation5], 1 }

</bundles_post_ra>
